<compile_context>
chip_gen: v5e
topology: v5e:2x2
jax: 0.10.0
libtpu: 0.0.40
codegen_flags: <defaults>
</compile_context>

<pallas_src>
import math
import functools

import jax
import jax.numpy as jnp
from jax import lax
from jax.experimental import pallas as pl
from jax.experimental.pallas import tpu as pltpu


_INV_SQRT2 = 1.0 / math.sqrt(2.0)

# Fully unroll the in-kernel H-chunk loop (static slices) up to this many
# chunks; beyond that use lax.fori_loop with aligned dynamic pl.ds offsets.
_STATIC_UNROLL_CHUNKS = 32


def _gelu_exact(x):
    # PyTorch nn.GELU() default: 0.5 * x * (1 + erf(x / sqrt(2)))
    return 0.5 * x * (1.0 + lax.erf(x * _INV_SQRT2))


def _round_up(n, m):
    return ((n + m - 1) // m) * m


def _pick_h_chunk(H, requested):
    """Largest chunk <= requested dividing H, preferring multiples of 128."""
    requested = max(1, min(requested, H))
    if requested == H:
        return H
    best = 0
    c = 128
    while c <= requested:
        if H % c == 0:
            best = c
        c += 128
    if best:
        return best
    for c in range(requested, 0, -1):
        if H % c == 0:
            return c
    return H


def mlp_lora_kernel(
    x_ref,
    w_fc_ref, b_fc_ref, a_fc_ref, bl_fc_ref,
    w_pr_ref, b_pr_ref, a_pr_ref, bl_pr_ref,
    o_ref,
    acc_ref,
    *, h_chunk, n_chunks, approximate_gelu,
):
    x = x_ref[...]                                            # (TM, D)
    tm = x.shape[0]
    r2 = a_pr_ref.shape[1]

    # LoRA down-projection of c_fc, hoisted out of the H-chunk loop.
    xa = jnp.dot(x, a_fc_ref[...], preferred_element_type=jnp.float32)
    xa = xa.astype(bl_fc_ref.dtype)                           # (TM, 2r)

    # Dense c_proj accumulator lives in VMEM scratch (only a (TM, TH) hidden
    # slice is ever live in registers).
    acc_ref[...] = jnp.zeros_like(acc_ref)                    # (TM, D) f32

    def chunk_body(c, ha_acc):
        hs = c * h_chunk
        if not isinstance(hs, int):
            hs = pl.multiple_of(hs, h_chunk)
        # ---- c_fc on this hidden chunk: x @ W + b + (x@A)@B ---------------
        h = jnp.dot(x, w_fc_ref[:, pl.ds(hs, h_chunk)],
                    preferred_element_type=jnp.float32)
        h = h + jnp.dot(xa, bl_fc_ref[:, pl.ds(hs, h_chunk)],
                        preferred_element_type=jnp.float32)
        h = h + b_fc_ref[:, pl.ds(hs, h_chunk)]               # f32 bias
        # ---- activation ----------------------------------------------------
        if approximate_gelu:
            h = jax.nn.gelu(h, approximate=True)              # EUP tanh path
        else:
            h = _gelu_exact(h)                                # PyTorch parity
        hc = h.astype(w_pr_ref.dtype)
        # ---- dense c_proj contribution, accumulated in VMEM scratch --------
        acc_ref[...] += jnp.dot(hc, w_pr_ref[pl.ds(hs, h_chunk), :],
                                preferred_element_type=jnp.float32)
        # ---- LoRA down-projection for c_proj (tiny, carried in registers) --
        return ha_acc + jnp.dot(hc, a_pr_ref[pl.ds(hs, h_chunk), :],
                                preferred_element_type=jnp.float32)

    ha = jnp.zeros((tm, r2), jnp.float32)
    if n_chunks <= _STATIC_UNROLL_CHUNKS:
        for c in range(n_chunks):                             # static slices
            ha = chunk_body(c, ha)
    else:
        ha = lax.fori_loop(0, n_chunks, chunk_body, ha)       # aligned pl.ds

    y = acc_ref[...]
    y = y + jnp.dot(ha.astype(bl_pr_ref.dtype), bl_pr_ref[...],
                    preferred_element_type=jnp.float32)
    y = y + b_pr_ref[...]
    o_ref[...] = y.astype(o_ref.dtype)


def mlp_lora_forward(x, params, *, scaling_fc, scaling_pr,
                     block_m=512, h_block=512,
                     matmul_dtype=jnp.bfloat16,
                     approximate_gelu=False,
                     vmem_limit_bytes=None):
    """x: (batch, seq, n_embd). Returns same shape/dtype as x."""
    B, T, D = x.shape
    M = B * T
    out_dtype = x.dtype

    (w_fc, b_fc, a1_fc, b1_fc, a2_fc, b2_fc,
     w_pr, b_pr, a1_pr, b1_pr, a2_pr, b2_pr) = params
    H = w_fc.shape[1]
    r2 = a1_fc.shape[1] + a2_fc.shape[1]

    # Fuse the two LoRA branches; fold 0.5*scaling into the small B factor.
    a_fc = jnp.concatenate([a1_fc, a2_fc], axis=1)                         # (D, 2r)
    bl_fc = jnp.concatenate([b1_fc, b2_fc], axis=0) * (0.5 * scaling_fc)   # (2r, H)
    a_pr = jnp.concatenate([a1_pr, a2_pr], axis=1)                         # (H, 2r)
    bl_pr = jnp.concatenate([b1_pr, b2_pr], axis=0) * (0.5 * scaling_pr)   # (2r, D)

    # Biases stay f32 (added to the f32 accumulators inside the kernel).
    b_fc = b_fc.astype(jnp.float32).reshape(1, H)
    b_pr = b_pr.astype(jnp.float32).reshape(1, D)

    if matmul_dtype is not None:
        cast = lambda a: a.astype(matmul_dtype)
        x = cast(x)
        w_fc, a_fc, bl_fc = cast(w_fc), cast(a_fc), cast(bl_fc)
        w_pr, a_pr, bl_pr = cast(w_pr), cast(a_pr), cast(bl_pr)

    # ---- choose M tile; avoid the jnp.pad HBM round-trip when possible ----
    m8 = _round_up(M, 8)
    tm = _round_up(min(block_m, m8), 8)
    if m8 % tm != 0:
        for cand in range(tm, 7, -8):
            if m8 % cand == 0:
                tm = cand
                break
    m_pad = _round_up(m8, tm)
    x2d = x.reshape(M, D)
    if m_pad != M:
        x2d = jnp.pad(x2d, ((0, m_pad - M), (0, 0)))
    grid = (m_pad // tm,)

    # ---- hidden-dimension chunking inside the kernel -----------------------
    h_chunk = _pick_h_chunk(H, h_block)
    n_chunks = H // h_chunk

    kernel = functools.partial(mlp_lora_kernel, h_chunk=h_chunk,
                               n_chunks=n_chunks,
                               approximate_gelu=approximate_gelu)

    in_itemsize = jnp.dtype(x2d.dtype).itemsize
    out_itemsize = jnp.dtype(out_dtype).itemsize
    resident_arrays = (w_fc, b_fc, a_fc, bl_fc, w_pr, b_pr, a_pr, bl_pr)
    resident_bytes = sum(int(a.size) * a.dtype.itemsize for a in resident_arrays)

    if vmem_limit_bytes is None:
        est = (2 * resident_bytes                      # conservative: 2x-buffered
               + 2 * tm * D * in_itemsize              # double-buffered x tiles
               + 2 * tm * D * out_itemsize             # double-buffered out tiles
               + tm * D * 4                            # f32 accumulator scratch
               + 3 * tm * h_chunk * 4)                 # live hidden chunk headroom
        vmem_limit_bytes = max(32 << 20, min(int(est * 1.3) + (2 << 20), 128 << 20))

    # Advisory cost estimate for the XLA scheduler (weights read once: resident).
    flops = 4 * M * D * H + 4 * M * r2 * (D + H)
    bytes_accessed = (resident_bytes + int(x2d.size) * in_itemsize
                      + M * D * out_itemsize)
    cost = pl.CostEstimate(flops=int(flops), transcendentals=int(M * H),
                           bytes_accessed=int(bytes_accessed))

    def build(single_buffer_weights):
        def resident(arr):
            if single_buffer_weights:
                return pl.BlockSpec(arr.shape, lambda i: (0, 0),
                                    pipeline_mode=pl.Buffered(1))
            return pl.BlockSpec(arr.shape, lambda i: (0, 0))

        return pl.pallas_call(
            kernel,
            out_shape=jax.ShapeDtypeStruct((m_pad, D), out_dtype),
            grid_spec=pltpu.PrefetchScalarGridSpec(
                num_scalar_prefetch=0,
                grid=grid,
                in_specs=[
                    pl.BlockSpec((tm, D), lambda i: (i, 0)),
                    resident(w_fc), resident(b_fc), resident(a_fc), resident(bl_fc),
                    resident(w_pr), resident(b_pr), resident(a_pr), resident(bl_pr),
                ],
                out_specs=pl.BlockSpec((tm, D), lambda i: (i, 0)),
                scratch_shapes=[pltpu.VMEM((tm, D), jnp.float32)],
            ),
            compiler_params=pltpu.CompilerParams(
                dimension_semantics=("parallel",),
                vmem_limit_bytes=vmem_limit_bytes),
            cost_estimate=cost,
        )

    args = (x2d, w_fc, b_fc, a_fc, bl_fc, w_pr, b_pr, a_pr, bl_pr)
    try:
        out2d = build(True)(*args)
    except Exception:
        # pipeline_mode=pl.Buffered(1) not supported by this JAX build; fall
        # back to default double-buffered resident weights (correct, more VMEM).
        out2d = build(False)(*args)

    return out2d[:M].reshape(B, T, D)


def _reference(x, params, *, scaling_fc, scaling_pr, approximate_gelu=False):
    (w_fc, b_fc, a1_fc, b1_fc, a2_fc, b2_fc,
     w_pr, b_pr, a1_pr, b1_pr, a2_pr, b2_pr) = params
    B, T, D = x.shape
    x2d = x.reshape(B * T, D)
    act = (lambda v: jax.nn.gelu(v, approximate=True)) if approximate_gelu \
        else _gelu_exact
    h = x2d @ w_fc + b_fc
    h = h + x2d @ (0.5 * (a1_fc @ b1_fc + a2_fc @ b2_fc)) * scaling_fc
    h = act(h)
    y = h @ w_pr + b_pr
    y = y + h @ (0.5 * (a1_pr @ b1_pr + a2_pr @ b2_pr)) * scaling_pr
    return y.reshape(B, T, D)


def _make_params(key, n_embd, hidden, lora_rank):
    keys = jax.random.split(key, 12)
    f32 = jnp.float32
    # weights stored as (in_features, out_features) == PyTorch weight.T
    w_fc = jax.random.normal(keys[0], (n_embd, hidden), f32) * 0.02
    b_fc = jax.random.normal(keys[1], (1, hidden), f32) * 0.02
    # LoRA B matrices are zero-init in PyTorch; use nonzero so path is exercised.
    a1_fc = jax.random.normal(keys[2], (n_embd, lora_rank), f32) * 0.1
    b1_fc = jax.random.normal(keys[3], (lora_rank, hidden), f32) * 0.1
    a2_fc = jax.random.normal(keys[4], (n_embd, lora_rank), f32) * 0.1
    b2_fc = jax.random.normal(keys[5], (lora_rank, hidden), f32) * 0.1
    w_pr = jax.random.normal(keys[6], (hidden, n_embd), f32) * 0.02
    b_pr = jax.random.normal(keys[7], (1, n_embd), f32) * 0.02
    a1_pr = jax.random.normal(keys[8], (hidden, lora_rank), f32) * 0.1
    b1_pr = jax.random.normal(keys[9], (lora_rank, n_embd), f32) * 0.1
    a2_pr = jax.random.normal(keys[10], (hidden, lora_rank), f32) * 0.1
    b2_pr = jax.random.normal(keys[11], (lora_rank, n_embd), f32) * 0.1
    return (w_fc, b_fc, a1_fc, b1_fc, a2_fc, b2_fc,
            w_pr, b_pr, a1_pr, b1_pr, a2_pr, b2_pr)


if __name__ == "__main__":
    batch, seq, n_embd = 2, 8, 32
    hidden = 4 * n_embd
    lora_rank = 8
    lora_alpha = 16.0
    scaling = lora_alpha / lora_rank

    key = jax.random.PRNGKey(0)
    kp, kx, kp2, kx2 = jax.random.split(key, 4)

    params = _make_params(kp, n_embd, hidden, lora_rank)
    x = jax.random.normal(kx, (batch, seq, n_embd), jnp.float32)
    ref = _reference(x, params, scaling_fc=scaling, scaling_pr=scaling)

    # 1) f32 operands, single M tile, single H chunk
    out = mlp_lora_forward(x, params, scaling_fc=scaling, scaling_pr=scaling,
                           matmul_dtype=jnp.float32)
    out = jax.block_until_ready(out)
    assert out.shape == (batch, seq, n_embd)
    assert jnp.allclose(out, ref, atol=1e-4, rtol=1e-4), "f32 mismatch"

    # 2) f32, multi-tile grid over M (pipelined path)
    out_tiled = mlp_lora_forward(x, params, scaling_fc=scaling,
                                 scaling_pr=scaling, matmul_dtype=jnp.float32,
                                 block_m=8)
    out_tiled = jax.block_until_ready(out_tiled)
    assert jnp.allclose(out_tiled, ref, atol=1e-4, rtol=1e-4), "tiled f32 mismatch"

    # 3) default bf16 operands, f32 accumulation (looser tolerance)
    out_bf16 = jax.block_until_ready(
        mlp_lora_forward(x, params, scaling_fc=scaling, scaling_pr=scaling))
    assert jnp.allclose(out_bf16, ref, atol=3e-2, rtol=3e-2), "bf16 mismatch"

    # 4) chunked hidden dimension: n_embd=64 -> H=256, h_block=128 -> 2 chunks
    n_embd2, hidden2 = 64, 256
    params2 = _make_params(kp2, n_embd2, hidden2, lora_rank)
    x2 = jax.random.normal(kx2, (batch, seq, n_embd2), jnp.float32)
    ref2 = _reference(x2, params2, scaling_fc=scaling, scaling_pr=scaling)
    out2 = mlp_lora_forward(x2, params2, scaling_fc=scaling, scaling_pr=scaling,
                            matmul_dtype=jnp.float32, h_block=128)
    out2 = jax.block_until_ready(out2)
    assert jnp.allclose(out2, ref2, atol=1e-4, rtol=1e-4), "chunked-H mismatch"

    # 5) approximate (tanh) GELU option
    ref_tanh = _reference(x, params, scaling_fc=scaling, scaling_pr=scaling,
                          approximate_gelu=True)
    out_tanh = mlp_lora_forward(x, params, scaling_fc=scaling,
                                scaling_pr=scaling, matmul_dtype=jnp.float32,
                                approximate_gelu=True)
    out_tanh = jax.block_until_ready(out_tanh)
    assert jnp.allclose(out_tanh, ref_tanh, atol=1e-4, rtol=1e-4), \
        "tanh-GELU mismatch"

    print("KERNEL_OK")
</pallas_src>

<mosaic_0001>
module attributes {stable_mosaic.version = 11 : i64} {
  func.func @mlp_lora_kernel(%arg0: i32, %arg1: memref<16x32xf32, #tpu.memory_space<vmem>>, %arg2: memref<32x128xf32, #tpu.memory_space<vmem>>, %arg3: memref<1x128xf32, #tpu.memory_space<vmem>>, %arg4: memref<32x16xf32, #tpu.memory_space<vmem>>, %arg5: memref<16x128xf32, #tpu.memory_space<vmem>>, %arg6: memref<128x32xf32, #tpu.memory_space<vmem>>, %arg7: memref<1x32xf32, #tpu.memory_space<vmem>>, %arg8: memref<128x16xf32, #tpu.memory_space<vmem>>, %arg9: memref<16x32xf32, #tpu.memory_space<vmem>>, %arg10: memref<16x32xf32, #tpu.memory_space<vmem>>, %arg11: memref<16x32xf32, #tpu.memory_space<vmem>>) attributes {dimension_semantics = [#tpu.dimension_semantics<parallel>], iteration_bounds = array<i64: 1>, scalar_prefetch = 0 : i64, scratch_operands = 1 : i64, tpu.core_type = #tpu.core_type<tc>, window_params = [{transform_indices = @transform_0, window_bounds = array<i64: 16, 32>}, {pipeline_mode = #tpu.pipeline_mode<synchronous>, transform_indices = @transform_1, window_bounds = array<i64: 32, 128>}, {pipeline_mode = #tpu.pipeline_mode<synchronous>, transform_indices = @transform_2, window_bounds = array<i64: 1, 128>}, {pipeline_mode = #tpu.pipeline_mode<synchronous>, transform_indices = @transform_3, window_bounds = array<i64: 32, 16>}, {pipeline_mode = #tpu.pipeline_mode<synchronous>, transform_indices = @transform_4, window_bounds = array<i64: 16, 128>}, {pipeline_mode = #tpu.pipeline_mode<synchronous>, transform_indices = @transform_5, window_bounds = array<i64: 128, 32>}, {pipeline_mode = #tpu.pipeline_mode<synchronous>, transform_indices = @transform_6, window_bounds = array<i64: 1, 32>}, {pipeline_mode = #tpu.pipeline_mode<synchronous>, transform_indices = @transform_7, window_bounds = array<i64: 128, 16>}, {pipeline_mode = #tpu.pipeline_mode<synchronous>, transform_indices = @transform_8, window_bounds = array<i64: 16, 32>}, {transform_indices = @transform_9, window_bounds = array<i64: 16, 32>}]} {
    %c0 = arith.constant 0 : index
    %c0_0 = arith.constant 0 : index
    %0 = vector.load %arg1[%c0, %c0_0] : memref<16x32xf32, #tpu.memory_space<vmem>>, vector<16x32xf32>
    %c0_1 = arith.constant 0 : index
    %c0_2 = arith.constant 0 : index
    %1 = vector.load %arg4[%c0_1, %c0_2] : memref<32x16xf32, #tpu.memory_space<vmem>>, vector<32x16xf32>
    %cst = arith.constant dense<0.000000e+00> : vector<16x16xf32>
    %2 = tpu.matmul %0, %1, %cst {dimension_numbers = #tpu.dot_dimension_numbers<[1], [0], [0], [1], [0, 0, 1, 1], [], []>} : vector<16x32xf32>, vector<32x16xf32>, vector<16x16xf32> -> vector<16x16xf32>
    %cst_3 = arith.constant 0.000000e+00 : f32
    %3 = vector.broadcast %cst_3 : f32 to vector<16x32xf32>
    %c0_4 = arith.constant 0 : index
    %c0_5 = arith.constant 0 : index
    %4 = vector.load %arg11[%c0_4, %c0_5] : memref<16x32xf32, #tpu.memory_space<vmem>>, vector<16x32xf32>
    tpu.vector_store %arg11[%c0_4, %c0_5], %3 {strides = array<i32>} : memref<16x32xf32, #tpu.memory_space<vmem>>, vector<16x32xf32>,
    %cst_6 = arith.constant 0.000000e+00 : f32
    %5 = vector.broadcast %cst_6 : f32 to vector<16x16xf32>
    %c0_7 = arith.constant 0 : index
    %c0_8 = arith.constant 0 : index
    %6 = vector.load %arg2[%c0_7, %c0_8] : memref<32x128xf32, #tpu.memory_space<vmem>>, vector<32x128xf32>
    %cst_9 = arith.constant dense<0.000000e+00> : vector<16x128xf32>
    %7 = tpu.matmul %0, %6, %cst_9 {dimension_numbers = #tpu.dot_dimension_numbers<[1], [0], [0], [1], [0, 0, 1, 1], [], []>} : vector<16x32xf32>, vector<32x128xf32>, vector<16x128xf32> -> vector<16x128xf32>
    %c0_10 = arith.constant 0 : index
    %c0_11 = arith.constant 0 : index
    %8 = vector.load %arg5[%c0_10, %c0_11] : memref<16x128xf32, #tpu.memory_space<vmem>>, vector<16x128xf32>
    %cst_12 = arith.constant dense<0.000000e+00> : vector<16x128xf32>
    %9 = tpu.matmul %2, %8, %cst_12 {dimension_numbers = #tpu.dot_dimension_numbers<[1], [0], [0], [1], [0, 0, 1, 1], [], []>} : vector<16x16xf32>, vector<16x128xf32>, vector<16x128xf32> -> vector<16x128xf32>
    %10 = arith.addf %7, %9 : vector<16x128xf32>
    %c0_13 = arith.constant 0 : index
    %c0_14 = arith.constant 0 : index
    %11 = vector.load %arg3[%c0_13, %c0_14] : memref<1x128xf32, #tpu.memory_space<vmem>>, vector<1x128xf32>
    %12 = vector.broadcast %11 : vector<1x128xf32> to vector<16x128xf32>
    %13 = arith.addf %10, %12 : vector<16x128xf32>
    %cst_15 = arith.constant 5.000000e-01 : f32
    %14 = vector.broadcast %cst_15 : f32 to vector<16x128xf32>
    %15 = arith.mulf %14, %13 : vector<16x128xf32>
    %cst_16 = arith.constant 0.707106769 : f32
    %16 = vector.broadcast %cst_16 : f32 to vector<16x128xf32>
    %17 = arith.mulf %13, %16 : vector<16x128xf32>
    %18 = math.erf %17 : vector<16x128xf32>
    %cst_17 = arith.constant 1.000000e+00 : f32
    %19 = vector.broadcast %cst_17 : f32 to vector<16x128xf32>
    %20 = arith.addf %19, %18 : vector<16x128xf32>
    %21 = arith.mulf %15, %20 : vector<16x128xf32>
    %c0_18 = arith.constant 0 : index
    %c0_19 = arith.constant 0 : index
    %22 = vector.load %arg11[%c0_18, %c0_19] : memref<16x32xf32, #tpu.memory_space<vmem>>, vector<16x32xf32>
    %c0_20 = arith.constant 0 : index
    %c0_21 = arith.constant 0 : index
    %23 = vector.load %arg6[%c0_20, %c0_21] : memref<128x32xf32, #tpu.memory_space<vmem>>, vector<128x32xf32>
    %cst_22 = arith.constant dense<0.000000e+00> : vector<16x32xf32>
    %24 = tpu.matmul %21, %23, %cst_22 {dimension_numbers = #tpu.dot_dimension_numbers<[1], [0], [0], [1], [0, 0, 1, 1], [], []>} : vector<16x128xf32>, vector<128x32xf32>, vector<16x32xf32> -> vector<16x32xf32>
    %25 = arith.addf %22, %24 : vector<16x32xf32>
    %c0_23 = arith.constant 0 : index
    %c0_24 = arith.constant 0 : index
    %26 = vector.load %arg11[%c0_23, %c0_24] : memref<16x32xf32, #tpu.memory_space<vmem>>, vector<16x32xf32>
    tpu.vector_store %arg11[%c0_23, %c0_24], %25 {strides = array<i32>} : memref<16x32xf32, #tpu.memory_space<vmem>>, vector<16x32xf32>,
    %c0_25 = arith.constant 0 : index
    %c0_26 = arith.constant 0 : index
    %27 = vector.load %arg8[%c0_25, %c0_26] : memref<128x16xf32, #tpu.memory_space<vmem>>, vector<128x16xf32>
    %cst_27 = arith.constant dense<0.000000e+00> : vector<16x16xf32>
    %28 = tpu.matmul %21, %27, %cst_27 {dimension_numbers = #tpu.dot_dimension_numbers<[1], [0], [0], [1], [0, 0, 1, 1], [], []>} : vector<16x128xf32>, vector<128x16xf32>, vector<16x16xf32> -> vector<16x16xf32>
    %29 = arith.addf %5, %28 : vector<16x16xf32>
    %c0_28 = arith.constant 0 : index
    %c0_29 = arith.constant 0 : index
    %30 = vector.load %arg11[%c0_28, %c0_29] : memref<16x32xf32, #tpu.memory_space<vmem>>, vector<16x32xf32>
    %c0_30 = arith.constant 0 : index
    %c0_31 = arith.constant 0 : index
    %31 = vector.load %arg9[%c0_30, %c0_31] : memref<16x32xf32, #tpu.memory_space<vmem>>, vector<16x32xf32>
    %cst_32 = arith.constant dense<0.000000e+00> : vector<16x32xf32>
    %32 = tpu.matmul %29, %31, %cst_32 {dimension_numbers = #tpu.dot_dimension_numbers<[1], [0], [0], [1], [0, 0, 1, 1], [], []>} : vector<16x16xf32>, vector<16x32xf32>, vector<16x32xf32> -> vector<16x32xf32>
    %33 = arith.addf %30, %32 : vector<16x32xf32>
    %c0_33 = arith.constant 0 : index
    %c0_34 = arith.constant 0 : index
    %34 = vector.load %arg7[%c0_33, %c0_34] : memref<1x32xf32, #tpu.memory_space<vmem>>, vector<1x32xf32>
    %35 = vector.broadcast %34 : vector<1x32xf32> to vector<16x32xf32>
    %36 = arith.addf %33, %35 : vector<16x32xf32>
    %c0_35 = arith.constant 0 : index
    %c0_36 = arith.constant 0 : index
    %37 = vector.load %arg10[%c0_35, %c0_36] : memref<16x32xf32, #tpu.memory_space<vmem>>, vector<16x32xf32>
    tpu.vector_store %arg10[%c0_35, %c0_36], %36 {strides = array<i32>} : memref<16x32xf32, #tpu.memory_space<vmem>>, vector<16x32xf32>,
    return
  }
  func.func @transform_0(%arg0: i32) -> (i32, i32) {
    %c0_i32 = arith.constant 0 : i32
    %c0_i32_0 = arith.constant 0 : i32
    return %arg0, %c0_i32 : i32, i32
  }
  func.func @transform_1(%arg0: i32) -> (i32, i32) {
    %c0_i32 = arith.constant 0 : i32
    %c0_i32_0 = arith.constant 0 : i32
    %c0_i32_1 = arith.constant 0 : i32
    return %c0_i32, %c0_i32_0 : i32, i32
  }
  func.func @transform_2(%arg0: i32) -> (i32, i32) {
    %c0_i32 = arith.constant 0 : i32
    %c0_i32_0 = arith.constant 0 : i32
    %c0_i32_1 = arith.constant 0 : i32
    return %c0_i32, %c0_i32_0 : i32, i32
  }
  func.func @transform_3(%arg0: i32) -> (i32, i32) {
    %c0_i32 = arith.constant 0 : i32
    %c0_i32_0 = arith.constant 0 : i32
    %c0_i32_1 = arith.constant 0 : i32
    return %c0_i32, %c0_i32_0 : i32, i32
  }
  func.func @transform_4(%arg0: i32) -> (i32, i32) {
    %c0_i32 = arith.constant 0 : i32
    %c0_i32_0 = arith.constant 0 : i32
    %c0_i32_1 = arith.constant 0 : i32
    return %c0_i32, %c0_i32_0 : i32, i32
  }
  func.func @transform_5(%arg0: i32) -> (i32, i32) {
    %c0_i32 = arith.constant 0 : i32
    %c0_i32_0 = arith.constant 0 : i32
    %c0_i32_1 = arith.constant 0 : i32
    return %c0_i32, %c0_i32_0 : i32, i32
  }
  func.func @transform_6(%arg0: i32) -> (i32, i32) {
    %c0_i32 = arith.constant 0 : i32
    %c0_i32_0 = arith.constant 0 : i32
    %c0_i32_1 = arith.constant 0 : i32
    return %c0_i32, %c0_i32_0 : i32, i32
  }
  func.func @transform_7(%arg0: i32) -> (i32, i32) {
    %c0_i32 = arith.constant 0 : i32
    %c0_i32_0 = arith.constant 0 : i32
    %c0_i32_1 = arith.constant 0 : i32
    return %c0_i32, %c0_i32_0 : i32, i32
  }
  func.func @transform_8(%arg0: i32) -> (i32, i32) {
    %c0_i32 = arith.constant 0 : i32
    %c0_i32_0 = arith.constant 0 : i32
    %c0_i32_1 = arith.constant 0 : i32
    return %c0_i32, %c0_i32_0 : i32, i32
  }
  func.func @transform_9(%arg0: i32) -> (i32, i32) {
    %c0_i32 = arith.constant 0 : i32
    %c0_i32_0 = arith.constant 0 : i32
    return %arg0, %c0_i32 : i32, i32
  }
}

module attributes {stable_mosaic.version = 11 : i64} {
  func.func @mlp_lora_kernel(%arg0: i32, %arg1: memref<16x32xf32, #tpu.memory_space<vmem>>, %arg2: memref<32x128xf32, #tpu.memory_space<vmem>>, %arg3: memref<1x128xf32, #tpu.memory_space<vmem>>, %arg4: memref<32x16xf32, #tpu.memory_space<vmem>>, %arg5: memref<16x128xf32, #tpu.memory_space<vmem>>, %arg6: memref<128x32xf32, #tpu.memory_space<vmem>>, %arg7: memref<1x32xf32, #tpu.memory_space<vmem>>, %arg8: memref<128x16xf32, #tpu.memory_space<vmem>>, %arg9: memref<16x32xf32, #tpu.memory_space<vmem>>, %arg10: memref<16x32xf32, #tpu.memory_space<vmem>>, %arg11: memref<16x32xf32, #tpu.memory_space<vmem>>) attributes {dimension_semantics = [#tpu.dimension_semantics<parallel>], iteration_bounds = array<i64: 1>, scalar_prefetch = 0 : i64, scratch_operands = 1 : i64, tpu.core_type = #tpu.core_type<tc>, window_params = [{transform_indices = @transform_0, window_bounds = array<i64: 16, 32>}, {pipeline_mode = #tpu.pipeline_mode<synchronous>, transform_indices = @transform_1, window_bounds = array<i64: 32, 128>}, {pipeline_mode = #tpu.pipeline_mode<synchronous>, transform_indices = @transform_2, window_bounds = array<i64: 1, 128>}, {pipeline_mode = #tpu.pipeline_mode<synchronous>, transform_indices = @transform_3, window_bounds = array<i64: 32, 16>}, {pipeline_mode = #tpu.pipeline_mode<synchronous>, transform_indices = @transform_4, window_bounds = array<i64: 16, 128>}, {pipeline_mode = #tpu.pipeline_mode<synchronous>, transform_indices = @transform_5, window_bounds = array<i64: 128, 32>}, {pipeline_mode = #tpu.pipeline_mode<synchronous>, transform_indices = @transform_6, window_bounds = array<i64: 1, 32>}, {pipeline_mode = #tpu.pipeline_mode<synchronous>, transform_indices = @transform_7, window_bounds = array<i64: 128, 16>}, {pipeline_mode = #tpu.pipeline_mode<synchronous>, transform_indices = @transform_8, window_bounds = array<i64: 16, 32>}, {transform_indices = @transform_9, window_bounds = array<i64: 16, 32>}]} {
    %c0 = arith.constant 0 : index
    %c0_0 = arith.constant 0 : index
    %0 = vector.load %arg1[%c0, %c0_0] : memref<16x32xf32, #tpu.memory_space<vmem>>, vector<16x32xf32>
    %c0_1 = arith.constant 0 : index
    %c0_2 = arith.constant 0 : index
    %1 = vector.load %arg4[%c0_1, %c0_2] : memref<32x16xf32, #tpu.memory_space<vmem>>, vector<32x16xf32>
    %cst = arith.constant dense<0.000000e+00> : vector<16x16xf32>
    %2 = tpu.matmul %0, %1, %cst {dimension_numbers = #tpu.dot_dimension_numbers<[1], [0], [0], [1], [0, 0, 1, 1], [], []>} : vector<16x32xf32>, vector<32x16xf32>, vector<16x16xf32> -> vector<16x16xf32>
    %cst_3 = arith.constant 0.000000e+00 : f32
    %3 = vector.broadcast %cst_3 : f32 to vector<16x32xf32>
    %c0_4 = arith.constant 0 : index
    %c0_5 = arith.constant 0 : index
    %4 = vector.load %arg11[%c0_4, %c0_5] : memref<16x32xf32, #tpu.memory_space<vmem>>, vector<16x32xf32>
    tpu.vector_store %arg11[%c0_4, %c0_5], %3 {strides = array<i32>} : memref<16x32xf32, #tpu.memory_space<vmem>>, vector<16x32xf32>,
    %cst_6 = arith.constant 0.000000e+00 : f32
    %5 = vector.broadcast %cst_6 : f32 to vector<16x16xf32>
    %c0_7 = arith.constant 0 : index
    %c0_8 = arith.constant 0 : index
    %6 = vector.load %arg2[%c0_7, %c0_8] : memref<32x128xf32, #tpu.memory_space<vmem>>, vector<32x128xf32>
    %cst_9 = arith.constant dense<0.000000e+00> : vector<16x128xf32>
    %7 = tpu.matmul %0, %6, %cst_9 {dimension_numbers = #tpu.dot_dimension_numbers<[1], [0], [0], [1], [0, 0, 1, 1], [], []>} : vector<16x32xf32>, vector<32x128xf32>, vector<16x128xf32> -> vector<16x128xf32>
    %c0_10 = arith.constant 0 : index
    %c0_11 = arith.constant 0 : index
    %8 = vector.load %arg5[%c0_10, %c0_11] : memref<16x128xf32, #tpu.memory_space<vmem>>, vector<16x128xf32>
    %cst_12 = arith.constant dense<0.000000e+00> : vector<16x128xf32>
    %9 = tpu.matmul %2, %8, %cst_12 {dimension_numbers = #tpu.dot_dimension_numbers<[1], [0], [0], [1], [0, 0, 1, 1], [], []>} : vector<16x16xf32>, vector<16x128xf32>, vector<16x128xf32> -> vector<16x128xf32>
    %10 = arith.addf %7, %9 : vector<16x128xf32>
    %c0_13 = arith.constant 0 : index
    %c0_14 = arith.constant 0 : index
    %11 = vector.load %arg3[%c0_13, %c0_14] : memref<1x128xf32, #tpu.memory_space<vmem>>, vector<1x128xf32>
    %12 = vector.broadcast %11 : vector<1x128xf32> to vector<16x128xf32>
    %13 = arith.addf %10, %12 : vector<16x128xf32>
    %cst_15 = arith.constant 5.000000e-01 : f32
    %14 = vector.broadcast %cst_15 : f32 to vector<16x128xf32>
    %15 = arith.mulf %14, %13 : vector<16x128xf32>
    %cst_16 = arith.constant 0.707106769 : f32
    %16 = vector.broadcast %cst_16 : f32 to vector<16x128xf32>
    %17 = arith.mulf %13, %16 : vector<16x128xf32>
    %18 = math.erf %17 : vector<16x128xf32>
    %cst_17 = arith.constant 1.000000e+00 : f32
    %19 = vector.broadcast %cst_17 : f32 to vector<16x128xf32>
    %20 = arith.addf %19, %18 : vector<16x128xf32>
    %21 = arith.mulf %15, %20 : vector<16x128xf32>
    %c0_18 = arith.constant 0 : index
    %c0_19 = arith.constant 0 : index
    %22 = vector.load %arg11[%c0_18, %c0_19] : memref<16x32xf32, #tpu.memory_space<vmem>>, vector<16x32xf32>
    %c0_20 = arith.constant 0 : index
    %c0_21 = arith.constant 0 : index
    %23 = vector.load %arg6[%c0_20, %c0_21] : memref<128x32xf32, #tpu.memory_space<vmem>>, vector<128x32xf32>
    %cst_22 = arith.constant dense<0.000000e+00> : vector<16x32xf32>
    %24 = tpu.matmul %21, %23, %cst_22 {dimension_numbers = #tpu.dot_dimension_numbers<[1], [0], [0], [1], [0, 0, 1, 1], [], []>} : vector<16x128xf32>, vector<128x32xf32>, vector<16x32xf32> -> vector<16x32xf32>
    %25 = arith.addf %22, %24 : vector<16x32xf32>
    %c0_23 = arith.constant 0 : index
    %c0_24 = arith.constant 0 : index
    %26 = vector.load %arg11[%c0_23, %c0_24] : memref<16x32xf32, #tpu.memory_space<vmem>>, vector<16x32xf32>
    tpu.vector_store %arg11[%c0_23, %c0_24], %25 {strides = array<i32>} : memref<16x32xf32, #tpu.memory_space<vmem>>, vector<16x32xf32>,
    %c0_25 = arith.constant 0 : index
    %c0_26 = arith.constant 0 : index
    %27 = vector.load %arg8[%c0_25, %c0_26] : memref<128x16xf32, #tpu.memory_space<vmem>>, vector<128x16xf32>
    %cst_27 = arith.constant dense<0.000000e+00> : vector<16x16xf32>
    %28 = tpu.matmul %21, %27, %cst_27 {dimension_numbers = #tpu.dot_dimension_numbers<[1], [0], [0], [1], [0, 0, 1, 1], [], []>} : vector<16x128xf32>, vector<128x16xf32>, vector<16x16xf32> -> vector<16x16xf32>
    %29 = arith.addf %5, %28 : vector<16x16xf32>
    %c0_28 = arith.constant 0 : index
    %c0_29 = arith.constant 0 : index
    %30 = vector.load %arg11[%c0_28, %c0_29] : memref<16x32xf32, #tpu.memory_space<vmem>>, vector<16x32xf32>
    %c0_30 = arith.constant 0 : index
    %c0_31 = arith.constant 0 : index
    %31 = vector.load %arg9[%c0_30, %c0_31] : memref<16x32xf32, #tpu.memory_space<vmem>>, vector<16x32xf32>
    %cst_32 = arith.constant dense<0.000000e+00> : vector<16x32xf32>
    %32 = tpu.matmul %29, %31, %cst_32 {dimension_numbers = #tpu.dot_dimension_numbers<[1], [0], [0], [1], [0, 0, 1, 1], [], []>} : vector<16x16xf32>, vector<16x32xf32>, vector<16x32xf32> -> vector<16x32xf32>
    %33 = arith.addf %30, %32 : vector<16x32xf32>
    %c0_33 = arith.constant 0 : index
    %c0_34 = arith.constant 0 : index
    %34 = vector.load %arg7[%c0_33, %c0_34] : memref<1x32xf32, #tpu.memory_space<vmem>>, vector<1x32xf32>
    %35 = vector.broadcast %34 : vector<1x32xf32> to vector<16x32xf32>
    %36 = arith.addf %33, %35 : vector<16x32xf32>
    %c0_35 = arith.constant 0 : index
    %c0_36 = arith.constant 0 : index
    %37 = vector.load %arg10[%c0_35, %c0_36] : memref<16x32xf32, #tpu.memory_space<vmem>>, vector<16x32xf32>
    tpu.vector_store %arg10[%c0_35, %c0_36], %36 {strides = array<i32>} : memref<16x32xf32, #tpu.memory_space<vmem>>, vector<16x32xf32>,
    return
  }
  func.func @transform_0(%arg0: i32) -> (i32, i32) {
    %c0_i32 = arith.constant 0 : i32
    %c0_i32_0 = arith.constant 0 : i32
    return %arg0, %c0_i32 : i32, i32
  }
  func.func @transform_1(%arg0: i32) -> (i32, i32) {
    %c0_i32 = arith.constant 0 : i32
    %c0_i32_0 = arith.constant 0 : i32
    %c0_i32_1 = arith.constant 0 : i32
    return %c0_i32, %c0_i32_0 : i32, i32
  }
  func.func @transform_2(%arg0: i32) -> (i32, i32) {
    %c0_i32 = arith.constant 0 : i32
    %c0_i32_0 = arith.constant 0 : i32
    %c0_i32_1 = arith.constant 0 : i32
    return %c0_i32, %c0_i32_0 : i32, i32
  }
  func.func @transform_3(%arg0: i32) -> (i32, i32) {
    %c0_i32 = arith.constant 0 : i32
    %c0_i32_0 = arith.constant 0 : i32
    %c0_i32_1 = arith.constant 0 : i32
    return %c0_i32, %c0_i32_0 : i32, i32
  }
  func.func @transform_4(%arg0: i32) -> (i32, i32) {
    %c0_i32 = arith.constant 0 : i32
    %c0_i32_0 = arith.constant 0 : i32
    %c0_i32_1 = arith.constant 0 : i32
    return %c0_i32, %c0_i32_0 : i32, i32
  }
  func.func @transform_5(%arg0: i32) -> (i32, i32) {
    %c0_i32 = arith.constant 0 : i32
    %c0_i32_0 = arith.constant 0 : i32
    %c0_i32_1 = arith.constant 0 : i32
    return %c0_i32, %c0_i32_0 : i32, i32
  }
  func.func @transform_6(%arg0: i32) -> (i32, i32) {
    %c0_i32 = arith.constant 0 : i32
    %c0_i32_0 = arith.constant 0 : i32
    %c0_i32_1 = arith.constant 0 : i32
    return %c0_i32, %c0_i32_0 : i32, i32
  }
  func.func @transform_7(%arg0: i32) -> (i32, i32) {
    %c0_i32 = arith.constant 0 : i32
    %c0_i32_0 = arith.constant 0 : i32
    %c0_i32_1 = arith.constant 0 : i32
    return %c0_i32, %c0_i32_0 : i32, i32
  }
  func.func @transform_8(%arg0: i32) -> (i32, i32) {
    %c0_i32 = arith.constant 0 : i32
    %c0_i32_0 = arith.constant 0 : i32
    %c0_i32_1 = arith.constant 0 : i32
    return %c0_i32, %c0_i32_0 : i32, i32
  }
  func.func @transform_9(%arg0: i32) -> (i32, i32) {
    %c0_i32 = arith.constant 0 : i32
    %c0_i32_0 = arith.constant 0 : i32
    return %arg0, %c0_i32 : i32, i32
  }
}

</mosaic_0001>

<bundles_post_ra>
// kernel: tpu_custom_call.1
= control target key start
LH: loop header
LB: loop body
LE: loop exit
PB: predicated region body
PF: predicated region fallthrough
CT: control target
= control target key end

     0   :  { %s648_s0 = inlined_call_operand.vmem [shape: f32[16,32], index: 0, kind: input, shape index: {}]   ;;  %s649_s1 = inlined_call_operand.vmem [shape: f32[32,128], index: 1, kind: input, shape index: {}]   ;;  %s650_s2 = inlined_call_operand.vmem [shape: f32[1,128], index: 2, kind: input, shape index: {}]   ;;  %s651_s3 = inlined_call_operand.vmem [shape: f32[32,16], index: 3, kind: input, shape index: {}]   ;;  %s652_s4 = inlined_call_operand.vmem [shape: f32[16,128], index: 4, kind: input, shape index: {}]   ;;  %s653_s5 = inlined_call_operand.vmem [shape: f32[128,32], index: 5, kind: input, shape index: {}]   ;;  %s654_s6 = inlined_call_operand.vmem [shape: f32[1,32], index: 6, kind: input, shape index: {}]   ;;  %s655_s7 = inlined_call_operand.vmem [shape: f32[128,16], index: 7, kind: input, shape index: {}]   ;;  %s656_s8 = inlined_call_operand.vmem [shape: f32[16,32], index: 8, kind: input, shape index: {}]   ;;  %s657_s9 = inlined_call_operand.hbm [shape: f32[16,32], index: 9, kind: output, shape index: {}]  }
   0x1   :  { %v38_v0 = vld [vmem:[%s651_s3 + $0x18] sm:$0xff]  ;;  %v37_v1 = vld [vmem:[%s651_s3 + $0x10] sm:$0xff]  ;;  %v36_v2 = vld [vmem:[%s651_s3 + $0x8] sm:$0xff] }
   0x2   :  { %58 = vmatpush.msra.mxu0 %v38_v0  ;;  %v76_v3 = vld [vmem:[%s652_s4 + $0x8] sm:$0xff] }
   0x3   :  { %98 = vmatpush.msra.mxu2 %v76_v3 }
   0x4   :  { %59 = vmatpush.msra.mxu0 %v37_v1 }
   0x5   :  { %14 = vsyncpa [#allocation4], 0  ;;  %v35_v4 = vld [vmem:[%s651_s3] sm:$0xff]  ;;  %vm39_vm0 = vcmask 261120   ;;  %v34_v6 = vld [vmem:[%s648_s0 + $0x8] sm:$0xff]  ;;  %vm77_vm1 = vcmask 130048  }
   0x6   :  { %60 = vmatpush.msra.mxu0 %v36_v2  ;;  %v33_v5 = vld [vmem:[%s648_s0] sm:$0xff]  ;;  %v74_v8 = vld [vmem:[%s649_s1 + $0x18] sm:$0xff]  ;;  %v73_v9 = vld [vmem:[%s649_s1 + $0x10] sm:$0xff]  ;;  %s416_s3 = smov [#allocation3]   ;;  %s357_s28 = sshll.u32 %s657_s9, 4  ;;  %s358_s28 = int_to_ptr.hbm [resolvable:$true] %s357_s28 }
   0x7   :  { %v75_v7 = vld [vmem:[%s652_s4] sm:$0xff]  ;;  %v72_v10 = vld [vmem:[%s649_s1 + $0x8] sm:$0xff]  ;;  %v241_v15 = vld [vmem:[%s653_s5 + $0x78] sm:$0xff]  ;;  %s355_s25 = sshll.u32 %s416_s3, 4  ;;  %s418_s29 = smov 8   ;;  %s356_s25 = int_to_ptr.vmem [resolvable:$true] %s355_s25 }
   0x8   :  { %61 = vmatpush.msra.mxu0 %v35_v4  ;;  %99 = vmatpush.msra.mxu2 %v75_v7  ;;  %v71_v11 = vld [vmem:[%s649_s1] sm:$0xff]  ;;  %v284_v16 = vld [vmem:[%s655_s7 + $0x78] sm:$0xff]  ;;  %v240_v17 = vld [vmem:[%s653_s5 + $0x70] sm:$0xff] }
   0x9   :  { %369 = vmatmul.msk.f32.vlgmr.msra.gmra.mxu0 %vm39_vm0, %v33_v5  ;;  %242 = vmatpush.msra.mxu3 %v241_v15  ;;  %v283_v18 = vld [vmem:[%s655_s7 + $0x70] sm:$0xff]  ;;  %v239_v19 = vld [vmem:[%s653_s5 + $0x68] sm:$0xff]  ;;  %v238_v21 = vld [vmem:[%s653_s5 + $0x60] sm:$0xff] }
   0xa   :  { %119 = vmatpush.msrb.mxu2 %v74_v8  ;;  %285 = vmatpush.msra.mxu1 %v284_v16  ;;  %v282_v20 = vld [vmem:[%s655_s7 + $0x68] sm:$0xff]  ;;  %v281_v22 = vld [vmem:[%s655_s7 + $0x60] sm:$0xff]  ;;  %v237_v23 = vld [vmem:[%s653_s5 + $0x58] sm:$0xff] }
   0xb   :  { %243 = vmatpush.msra.mxu3 %v240_v17  ;;  %v280_v24 = vld [vmem:[%s655_s7 + $0x58] sm:$0xff]  ;;  %v236_v26 = vld [vmem:[%s653_s5 + $0x50] sm:$0xff]  ;;  %v235_v28 = vld [vmem:[%s653_s5 + $0x48] sm:$0xff] }
   0xc   :  { %120 = vmatpush.msrb.mxu2 %v73_v9  ;;  %286 = vmatpush.msra.mxu1 %v283_v18  ;;  %v279_v27 = vld [vmem:[%s655_s7 + $0x50] sm:$0xff]  ;;  %v278_v29 = vld [vmem:[%s655_s7 + $0x48] sm:$0xff]  ;;  %v234_v30 = vld [vmem:[%s653_s5 + $0x40] sm:$0xff] }
   0xd   :  { %244 = vmatpush.msra.mxu3 %v239_v19  ;;  %v277_v31 = vld [vmem:[%s655_s7 + $0x40] sm:$0xff]  ;;  %v233_v33 = vld [vmem:[%s653_s5 + $0x38] sm:$0xff]  ;;  %v232_v37 = vld [vmem:[%s653_s5 + $0x30] sm:$0xff] }
   0xe   :  { %121 = vmatpush.msrb.mxu2 %v72_v10  ;;  %287 = vmatpush.msra.mxu1 %v282_v20  ;;  %v383_v32 = vld [vmem:[%s650_s2] ss:$0 sm:$0xff]  ;;  %v276_v34 = vld [vmem:[%s655_s7 + $0x38] sm:$0xff]  ;;  %v275_v38 = vld [vmem:[%s655_s7 + $0x30] sm:$0xff] }
   0xf   :  { %245 = vmatpush.msra.mxu3 %v238_v21  ;;  %v231_v40 = vld [vmem:[%s653_s5 + $0x28] sm:$0xff]  ;;  %v230_v43 = vld [vmem:[%s653_s5 + $0x20] sm:$0xff]  ;;  %v229_v46 = vld [vmem:[%s653_s5 + $0x18] sm:$0xff] }
  0x10   :  { %122 = vmatpush.msrb.mxu2 %v71_v11  ;;  %288 = vmatpush.msra.mxu1 %v281_v22  ;;  %v274_v41 = vld [vmem:[%s655_s7 + $0x28] sm:$0xff]  ;;  %v273_v44 = vld [vmem:[%s655_s7 + $0x20] sm:$0xff]  ;;  %v272_v47 = vld [vmem:[%s655_s7 + $0x18] sm:$0xff] }
  0x11   :  { %370 = vmatmul.msk.f32.gmra.mxu0 %vm39_vm0, %v34_v6  ;;  %246 = vmatpush.msra.mxu3 %v237_v23  ;;  %v228_v51 = vld [vmem:[%s653_s5 + $0x10] sm:$0xff]  ;;  %v227_v54 = vld [vmem:[%s653_s5 + $0x8] sm:$0xff]  ;;  %v226_v58 = vld [vmem:[%s653_s5] sm:$0xff] }
  0x12   :  { %289 = vmatpush.msra.mxu1 %v280_v24  ;;  %v271_v52 = vld [vmem:[%s655_s7 + $0x10] sm:$0xff]  ;;  %v270_v55 = vld [vmem:[%s655_s7 + $0x8] sm:$0xff]  ;;  %v269_v59 = vld [vmem:[%s655_s7] sm:$0xff] }
  0x13   :  { %247 = vmatpush.msra.mxu3 %v236_v26  ;;  %v311_v26 = vld [vmem:[%s656_s8 + $0x8] sm:$0xff] }
  0x14   :  { %290 = vmatpush.msra.mxu1 %v279_v27  ;;  %v310_v27 = vld [vmem:[%s656_s8] sm:$0xff]  ;;  %332 = vmatpush.msrb.mxu0 %v311_v26 }
  0x15   :  { %248 = vmatpush.msra.mxu3 %v235_v28 }
  0x16   :  { %291 = vmatpush.msra.mxu1 %v278_v29  ;;  %333 = vmatpush.msrb.mxu0 %v310_v27 }
  0x17   :  { %249 = vmatpush.msra.mxu3 %v234_v30 }
  0x18   :  { %292 = vmatpush.msra.mxu1 %v277_v31 }
  0x19   :  { %250 = vmatpush.msra.mxu3 %v233_v33 }
  0x1a   :  { %293 = vmatpush.msra.mxu1 %v276_v34 }
  0x1b   :  { %251 = vmatpush.msra.mxu3 %v232_v37 }
  0x1c   :  { %294 = vmatpush.msra.mxu1 %v275_v38 }
  0x1d   :  { %252 = vmatpush.msra.mxu3 %v231_v40 }
  0x1e   :  { %295 = vmatpush.msra.mxu1 %v274_v41 }
  0x1f   :  { %253 = vmatpush.msra.mxu3 %v230_v43 }
  0x20   :  { %296 = vmatpush.msra.mxu1 %v273_v44 }
  0x21   :  { %254 = vmatpush.msra.mxu3 %v229_v46 }
  0x22   :  { %297 = vmatpush.msra.mxu1 %v272_v47 }
  0x23   :  { %255 = vmatpush.msra.mxu3 %v228_v51 }
  0x24   :  { %298 = vmatpush.msra.mxu1 %v271_v52 }
  0x25   :  { %256 = vmatpush.msra.mxu3 %v227_v54 }
  0x26   :  { %299 = vmatpush.msra.mxu1 %v270_v55 }
  0x27   :  { %257 = vmatpush.msra.mxu3 %v226_v58 }
  0x28   :  { %300 = vmatpush.msra.mxu1 %v269_v59 }
  0x86   :  { %v63_v12 = vpop.f32.mrf.mxu0 }
  0x87   :  { %371 = vmatmul.msk.f32.vlgmr.msra.gmra.mxu2 %vm77_vm1, %v63_v12 }
  0x8e   :  { %v66_v13 = vpop.f32.mrf.mxu0 }
  0x8f   :  { %372 = vmatmul.msk.f32.gmra.mxu2 %vm77_vm1, %v66_v13 }
  0x97   :  { %373 = vmatmul.msk.f32.vlgmr.msrb.gmra.mxu2 %vm39_vm0, %v33_v5 }
  0x9f   :  { %374 = vmatmul.msk.f32.gmra.mxu2 %vm39_vm0, %v34_v6 }
 0x10a   :  { %v101_v14 = vpop.f32.mrf.mxu2 }
 0x112   :  { %v104_v25 = vpop.f32.mrf.mxu2 }
 0x11a   :  { %v124_v35 = vpop.f32.mrf.mxu2 }
 0x11b   :  { %v125_v36 = vadd.f32 %v124_v35, %v101_v14 }
 0x11d   :  { %v574_v39 = vadd.f32 %v383_v32, %v125_v36 }
 0x11f   :  { %v583_v42 = vmul.f32 0.70710677, %v574_v39 }
 0x121   :  { %v140_v45 = vmul.f32 %v583_v42, %v583_v42 }
 0x122   :  { %v127_v48 = vpop.f32.mrf.mxu2 }
 0x123   :  { %v141_v49 = vmin.f32 %v140_v45, 16.0  ;;  %v128_v50 = vadd.f32 %v127_v48, %v104_v25 }
 0x125   :  { %v605_v53 = vadd.f32 %v383_v32, %v128_v50  ;;  %v142_v56 = vmul.f32 2.1237322e-06, %v141_v49  ;;  %v153_v57 = vmul.f32 3.8918573e-05, %v141_v49 }
 0x127   :  { %v620_v60 = vmul.f32 0.70710677, %v605_v53  ;;  %v143_v61 = vadd.f32 0.00028619796, %v142_v56  ;;  %v154_v62 = vadd.f32 0.001143296, %v153_v57 }
 0x129   :  { %v180_v63 = vmul.f32 %v620_v60, %v620_v60  ;;  %v144_v0 = vmul.f32 %v143_v61, %v141_v49  ;;  %v155_v1 = vmul.f32 %v154_v62, %v141_v49  ;;  %v136_v62 = vmul.f32 0.5, %v574_v39 }
 0x12a   :  { %v415_v39 = vmov 0.0  }
 0x12b   :  { %v181_v2 = vmin.f32 %v180_v63, 16.0  ;;  %v156_v3 = vadd.f32 0.014752088, %v155_v1  ;;  %v145_v4 = vadd.f32 0.0036580483, %v144_v0  ;;  %69 = vst.msk [vmem:[#allocation2] sm:$0xff] %vm39_vm0, %v415_v39 }
 0x12c   :  { %70 = vst.msk [vmem:[#allocation2 + $0x8] sm:$0xff] %vm39_vm0, %v415_v39 }
 0x12d   :  { %v157_v5 = vmul.f32 %v156_v3, %v141_v49  ;;  %v182_v6 = vmul.f32 2.1237322e-06, %v181_v2  ;;  %v193_v7 = vmul.f32 3.8918573e-05, %v181_v2  ;;  %v146_v10 = vmul.f32 %v145_v4, %v141_v49 }
 0x12f   :  { %v158_v8 = vadd.f32 0.112945676, %v157_v5  ;;  %v183_v9 = vadd.f32 0.00028619796, %v182_v6  ;;  %v194_v11 = vadd.f32 0.001143296, %v193_v7 }
 0x130   :  { %v147_v16 = vadd.f32 0.05243302, %v146_v10  ;;  %v137_v7 = vmul.f32 0.5, %v605_v53 }
 0x131   :  { %v159_v12 = vmul.f32 %v158_v8, %v141_v49  ;;  %v184_v13 = vmul.f32 %v183_v9, %v181_v2  ;;  %v195_v14 = vmul.f32 %v194_v11, %v181_v2 }
 0x132   :  { %v148_v22 = vmul.f32 %v147_v16, %v141_v49  ;;  %v384_v16 = vld [vmem:[%s654_s6] ss:$0 sm:$0xff]  ;;  %s417_s6 = smov 128  }
 0x133   :  { %v160_v15 = vadd.f32 0.4994258, %v159_v12  ;;  %v196_v17 = vadd.f32 0.014752088, %v195_v14  ;;  %v185_v19 = vadd.f32 0.0036580483, %v184_v13 }
 0x134   :  { %v149_v28 = vadd.f32 0.18741608, %v148_v22  ;;  %v225_v53 = vld [vmem:[#allocation2 + $0x8] sm:$0xff] }
 0x135   :  { %v161_v18 = vmul.f32 %v160_v15, %v141_v49  ;;  %v197_v20 = vmul.f32 %v196_v17, %v181_v2  ;;  %v186_v24 = vmul.f32 %v185_v19, %v181_v2 }
 0x136   :  { %v150_v33 = vmul.f32 %v149_v28, %v141_v49 }
 0x137   :  { %v162_v21 = vadd.f32 1.0, %v161_v18  ;;  %v198_v23 = vadd.f32 0.112945676, %v197_v20  ;;  %v187_v30 = vadd.f32 0.05243302, %v186_v24 }
 0x138   :  { %v151_v40 = vadd.f32 1.1283791, %v150_v33 }
 0x139   :  { %385 = vrcp.f32 %v162_v21  ;;  %v199_v25 = vmul.f32 %v198_v23, %v181_v2  ;;  %v188_v36 = vmul.f32 %v187_v30, %v181_v2  ;;  %v174_v38 = vand.u32 2147483648, %v162_v21 }
 0x13a   :  { %v172_v43 = vand.u32 2147483647, %v162_v21  ;;  %vm168_vm3 = vweird.f32 %v162_v21  ;;  %v152_v48 = vmul.f32 %v151_v40, %v583_v42 }
 0x13b   :  { %v200_v29 = vadd.f32 0.4994258, %v199_v25  ;;  %v189_v44 = vadd.f32 0.18741608, %v188_v36  ;;  %v175_v46 = vor.u32 1.1754944e-38, %v174_v38 }
 0x13c   :  { %vm173_vm5 = vcmp.eq.f32.partialorder %v172_v43, 8.507059e+37 }
 0x13d   :  { %v201_v31 = vmul.f32 %v200_v29, %v181_v2  ;;  %v190_v51 = vmul.f32 %v189_v44, %v181_v2 }
 0x13f   :  { %v386_v32 = vpop.eup %385  ;;  %v202_v35 = vadd.f32 1.0, %v201_v31  ;;  %v191_v58 = vadd.f32 1.1283791, %v190_v51 }
 0x140   :  { %v164_v34 = vmul.f32 %v386_v32, %v162_v21  ;;  %vm169_vm2 = vweird.f32 %v386_v32 }
 0x141   :  { %387 = vrcp.f32 %v202_v35  ;;  %vm170_vm4 = vmor %vm168_vm3, %vm169_vm2  ;;  %v214_v57 = vand.u32 2147483648, %v202_v35  ;;  %v212_v61 = vand.u32 2147483647, %v202_v35  ;;  %vm208_vm7 = vweird.f32 %v202_v35 }
 0x142   :  { %v165_v37 = vsub.f32 1.0, %v164_v34  ;;  %v192_v3 = vmul.f32 %v191_v58, %v620_v60  ;;  %v224_v60 = vld [vmem:[#allocation2] sm:$0xff] }
 0x143   :  { %v215_v42 = vor.u32 1.1754944e-38, %v214_v57  ;;  %vm213_vm9 = vcmp.eq.f32.partialorder %v212_v61, 8.507059e+37 }
 0x144   :  { %v166_v41 = vmul.f32 %v386_v32, %v165_v37 }
 0x146   :  { %v167_v45 = vadd.f32 %v386_v32, %v166_v41 }
 0x147   :  { %v388_v47 = vpop.eup %387 }
 0x148   :  { %v171_v50 = vsel %vm170_vm4, %v386_v32, %v167_v45  ;;  %v204_v52 = vmul.f32 %v388_v47, %v202_v35  ;;  %vm209_vm6 = vweird.f32 %v388_v47 }
 0x149   :  { %v176_v49 = vsel %vm173_vm5, %v175_v46, %v171_v50  ;;  %vm210_vm8 = vmor %vm208_vm7, %vm209_vm6 }
 0x14a   :  { %v177_v54 = vmul.f32 %v176_v49, %v152_v48  ;;  %v205_v55 = vsub.f32 1.0, %v204_v52 }
 0x14c   :  { %v375_v56 = vclamps-f32 %v177_v54, 1.0  ;;  %v206_v59 = vmul.f32 %v388_v47, %v205_v55 }
 0x14e   :  { %v220_v63 = vadd.f32 1.0, %v375_v56  ;;  %v207_v0 = vadd.f32 %v388_v47, %v206_v59 }
 0x150   :  { %v222_v1 = vmul.f32 %v220_v63, %v136_v62  ;;  %v211_v2 = vsel %vm210_vm8, %v388_v47, %v207_v0 }
 0x151   :  { %v216_v4 = vsel %vm213_vm9, %v215_v42, %v211_v2 }
 0x152   :  { %258 = vmatmul.f32.vlgmr.msra.gmra.mxu3 %v222_v1  ;;  %301 = vmatmul.f32.vlgmr.msra.gmra.mxu1 %v222_v1  ;;  %v217_v5 = vmul.f32 %v216_v4, %v192_v3 }
 0x154   :  { %v376_v6 = vclamps-f32 %v217_v5, 1.0 }
 0x156   :  { %v221_v8 = vadd.f32 1.0, %v376_v6 }
 0x158   :  { %v223_v9 = vmul.f32 %v221_v8, %v137_v7 }
 0x15a   :  { %261 = vmatmul.f32.gmra.mxu3 %v223_v9  ;;  %304 = vmatmul.f32.gmra.mxu1 %v223_v9 }
 0x1cf   :  { %v302_v10 = vpop.f32.mrf.mxu1 }
 0x1d0   :  { %377 = vmatmul.msk.f32.vlgmr.msrb.gmra.mxu0 %vm77_vm1, %v302_v10 }
 0x1d5   :  { %v259_v11 = vpop.f32.mrf.mxu3 }
 0x1d6   :  { %v265_v12 = vadd.f32 %v259_v11, %v224_v60 }
 0x1d7   :  { %v305_v13 = vpop.f32.mrf.mxu1 }
 0x1d8   :  { %267 = vst.msk [vmem:[#allocation2] sm:$0xff] %vm39_vm0, %v265_v12  ;;  %378 = vmatmul.msk.f32.gmra.mxu0 %vm77_vm1, %v305_v13 }
 0x1dd   :  { %v262_v14 = vpop.f32.mrf.mxu3 }
 0x1de   :  { %v266_v15 = vadd.f32 %v262_v14, %v225_v53 }
 0x1df   :  { %v308_v17 = vld [vmem:[#allocation2] sm:$0xff] }
 0x1e0   :  { %268 = vst.msk [vmem:[#allocation2 + $0x8] sm:$0xff] %vm39_vm0, %v266_v15 }
 0x1e7   :  { %v309_v21 = vld [vmem:[#allocation2 + $0x8] sm:$0xff] }
 0x24d   :  { %v335_v18 = vpop.f32.mrf.mxu0 }
 0x24e   :  { %v341_v19 = vadd.f32 %v335_v18, %v308_v17 }
 0x250   :  { %v347_v20 = vadd.f32 %v384_v16, %v341_v19 }
 0x252   :  { %349 = vst.msk [vmem:[#allocation3] sm:$0xff] %vm39_vm0, %v347_v20 }
 0x255   :  { %v338_v22 = vpop.f32.mrf.mxu0 }
 0x256   :  { %v342_v23 = vadd.f32 %v338_v22, %v309_v21 }
 0x258   :  { %v348_v24 = vadd.f32 %v384_v16, %v342_v23 }
 0x25a   :  { %350 = vst.msk [vmem:[#allocation3 + $0x8] sm:$0xff] %vm39_vm0, %v348_v24 }
 0x25b   :  { %363 = dma.vmem_to_hbm [thread:$0]  %s356_s25, 256, %s358_s28, [#allocation4], %s417_s6, %s417_s6, %s418_s29  }
 0x25c   :  { %413 = dma.done.wait [#allocation4], 256  }
 0x25d   :  { %414 = vsyncadd [#allocation4], 4294967040 }
 0x25e   :  { %368 = vsyncpa [#allocation4], 1 }

// kernel: tpu_custom_call.1
= control target key start
LH: loop header
LB: loop body
LE: loop exit
PB: predicated region body
PF: predicated region fallthrough
CT: control target
= control target key end

     0   :  { %s648_s0 = inlined_call_operand.vmem [shape: f32[16,32], index: 0, kind: input, shape index: {}]   ;;  %s649_s1 = inlined_call_operand.vmem [shape: f32[32,128], index: 1, kind: input, shape index: {}]   ;;  %s650_s2 = inlined_call_operand.vmem [shape: f32[1,128], index: 2, kind: input, shape index: {}]   ;;  %s651_s3 = inlined_call_operand.vmem [shape: f32[32,16], index: 3, kind: input, shape index: {}]   ;;  %s652_s4 = inlined_call_operand.vmem [shape: f32[16,128], index: 4, kind: input, shape index: {}]   ;;  %s653_s5 = inlined_call_operand.vmem [shape: f32[128,32], index: 5, kind: input, shape index: {}]   ;;  %s654_s6 = inlined_call_operand.vmem [shape: f32[1,32], index: 6, kind: input, shape index: {}]   ;;  %s655_s7 = inlined_call_operand.vmem [shape: f32[128,16], index: 7, kind: input, shape index: {}]   ;;  %s656_s8 = inlined_call_operand.vmem [shape: f32[16,32], index: 8, kind: input, shape index: {}]   ;;  %s657_s9 = inlined_call_operand.hbm [shape: f32[16,32], index: 9, kind: output, shape index: {}]  }
   0x1   :  { %v38_v0 = vld [vmem:[%s651_s3 + $0x18] sm:$0xff]  ;;  %v37_v1 = vld [vmem:[%s651_s3 + $0x10] sm:$0xff]  ;;  %v36_v2 = vld [vmem:[%s651_s3 + $0x8] sm:$0xff] }
   0x2   :  { %58 = vmatpush.msra.mxu0 %v38_v0  ;;  %v76_v3 = vld [vmem:[%s652_s4 + $0x8] sm:$0xff] }
   0x3   :  { %98 = vmatpush.msra.mxu2 %v76_v3 }
   0x4   :  { %59 = vmatpush.msra.mxu0 %v37_v1 }
   0x5   :  { %14 = vsyncpa [#allocation4], 0  ;;  %v35_v4 = vld [vmem:[%s651_s3] sm:$0xff]  ;;  %vm39_vm0 = vcmask 261120   ;;  %v34_v6 = vld [vmem:[%s648_s0 + $0x8] sm:$0xff]  ;;  %vm77_vm1 = vcmask 130048  }
   0x6   :  { %60 = vmatpush.msra.mxu0 %v36_v2  ;;  %v33_v5 = vld [vmem:[%s648_s0] sm:$0xff]  ;;  %v74_v8 = vld [vmem:[%s649_s1 + $0x18] sm:$0xff]  ;;  %v73_v9 = vld [vmem:[%s649_s1 + $0x10] sm:$0xff]  ;;  %s416_s3 = smov [#allocation3]   ;;  %s357_s28 = sshll.u32 %s657_s9, 4  ;;  %s358_s28 = int_to_ptr.hbm [resolvable:$true] %s357_s28 }
   0x7   :  { %v75_v7 = vld [vmem:[%s652_s4] sm:$0xff]  ;;  %v72_v10 = vld [vmem:[%s649_s1 + $0x8] sm:$0xff]  ;;  %v241_v15 = vld [vmem:[%s653_s5 + $0x78] sm:$0xff]  ;;  %s355_s25 = sshll.u32 %s416_s3, 4  ;;  %s418_s29 = smov 8   ;;  %s356_s25 = int_to_ptr.vmem [resolvable:$true] %s355_s25 }
   0x8   :  { %61 = vmatpush.msra.mxu0 %v35_v4  ;;  %99 = vmatpush.msra.mxu2 %v75_v7  ;;  %v71_v11 = vld [vmem:[%s649_s1] sm:$0xff]  ;;  %v284_v16 = vld [vmem:[%s655_s7 + $0x78] sm:$0xff]  ;;  %v240_v17 = vld [vmem:[%s653_s5 + $0x70] sm:$0xff] }
   0x9   :  { %369 = vmatmul.msk.f32.vlgmr.msra.gmra.mxu0 %vm39_vm0, %v33_v5  ;;  %242 = vmatpush.msra.mxu3 %v241_v15  ;;  %v283_v18 = vld [vmem:[%s655_s7 + $0x70] sm:$0xff]  ;;  %v239_v19 = vld [vmem:[%s653_s5 + $0x68] sm:$0xff]  ;;  %v238_v21 = vld [vmem:[%s653_s5 + $0x60] sm:$0xff] }
   0xa   :  { %119 = vmatpush.msrb.mxu2 %v74_v8  ;;  %285 = vmatpush.msra.mxu1 %v284_v16  ;;  %v282_v20 = vld [vmem:[%s655_s7 + $0x68] sm:$0xff]  ;;  %v281_v22 = vld [vmem:[%s655_s7 + $0x60] sm:$0xff]  ;;  %v237_v23 = vld [vmem:[%s653_s5 + $0x58] sm:$0xff] }
   0xb   :  { %243 = vmatpush.msra.mxu3 %v240_v17  ;;  %v280_v24 = vld [vmem:[%s655_s7 + $0x58] sm:$0xff]  ;;  %v236_v26 = vld [vmem:[%s653_s5 + $0x50] sm:$0xff]  ;;  %v235_v28 = vld [vmem:[%s653_s5 + $0x48] sm:$0xff] }
   0xc   :  { %120 = vmatpush.msrb.mxu2 %v73_v9  ;;  %286 = vmatpush.msra.mxu1 %v283_v18  ;;  %v279_v27 = vld [vmem:[%s655_s7 + $0x50] sm:$0xff]  ;;  %v278_v29 = vld [vmem:[%s655_s7 + $0x48] sm:$0xff]  ;;  %v234_v30 = vld [vmem:[%s653_s5 + $0x40] sm:$0xff] }
   0xd   :  { %244 = vmatpush.msra.mxu3 %v239_v19  ;;  %v277_v31 = vld [vmem:[%s655_s7 + $0x40] sm:$0xff]  ;;  %v233_v33 = vld [vmem:[%s653_s5 + $0x38] sm:$0xff]  ;;  %v232_v37 = vld [vmem:[%s653_s5 + $0x30] sm:$0xff] }
   0xe   :  { %121 = vmatpush.msrb.mxu2 %v72_v10  ;;  %287 = vmatpush.msra.mxu1 %v282_v20  ;;  %v383_v32 = vld [vmem:[%s650_s2] ss:$0 sm:$0xff]  ;;  %v276_v34 = vld [vmem:[%s655_s7 + $0x38] sm:$0xff]  ;;  %v275_v38 = vld [vmem:[%s655_s7 + $0x30] sm:$0xff] }
   0xf   :  { %245 = vmatpush.msra.mxu3 %v238_v21  ;;  %v231_v40 = vld [vmem:[%s653_s5 + $0x28] sm:$0xff]  ;;  %v230_v43 = vld [vmem:[%s653_s5 + $0x20] sm:$0xff]  ;;  %v229_v46 = vld [vmem:[%s653_s5 + $0x18] sm:$0xff] }
  0x10   :  { %122 = vmatpush.msrb.mxu2 %v71_v11  ;;  %288 = vmatpush.msra.mxu1 %v281_v22  ;;  %v274_v41 = vld [vmem:[%s655_s7 + $0x28] sm:$0xff]  ;;  %v273_v44 = vld [vmem:[%s655_s7 + $0x20] sm:$0xff]  ;;  %v272_v47 = vld [vmem:[%s655_s7 + $0x18] sm:$0xff] }
  0x11   :  { %370 = vmatmul.msk.f32.gmra.mxu0 %vm39_vm0, %v34_v6  ;;  %246 = vmatpush.msra.mxu3 %v237_v23  ;;  %v228_v51 = vld [vmem:[%s653_s5 + $0x10] sm:$0xff]  ;;  %v227_v54 = vld [vmem:[%s653_s5 + $0x8] sm:$0xff]  ;;  %v226_v58 = vld [vmem:[%s653_s5] sm:$0xff] }
  0x12   :  { %289 = vmatpush.msra.mxu1 %v280_v24  ;;  %v271_v52 = vld [vmem:[%s655_s7 + $0x10] sm:$0xff]  ;;  %v270_v55 = vld [vmem:[%s655_s7 + $0x8] sm:$0xff]  ;;  %v269_v59 = vld [vmem:[%s655_s7] sm:$0xff] }
  0x13   :  { %247 = vmatpush.msra.mxu3 %v236_v26  ;;  %v311_v26 = vld [vmem:[%s656_s8 + $0x8] sm:$0xff] }
  0x14   :  { %290 = vmatpush.msra.mxu1 %v279_v27  ;;  %v310_v27 = vld [vmem:[%s656_s8] sm:$0xff]  ;;  %332 = vmatpush.msrb.mxu0 %v311_v26 }
  0x15   :  { %248 = vmatpush.msra.mxu3 %v235_v28 }
  0x16   :  { %291 = vmatpush.msra.mxu1 %v278_v29  ;;  %333 = vmatpush.msrb.mxu0 %v310_v27 }
  0x17   :  { %249 = vmatpush.msra.mxu3 %v234_v30 }
  0x18   :  { %292 = vmatpush.msra.mxu1 %v277_v31 }
  0x19   :  { %250 = vmatpush.msra.mxu3 %v233_v33 }
  0x1a   :  { %293 = vmatpush.msra.mxu1 %v276_v34 }
  0x1b   :  { %251 = vmatpush.msra.mxu3 %v232_v37 }
  0x1c   :  { %294 = vmatpush.msra.mxu1 %v275_v38 }
  0x1d   :  { %252 = vmatpush.msra.mxu3 %v231_v40 }
  0x1e   :  { %295 = vmatpush.msra.mxu1 %v274_v41 }
  0x1f   :  { %253 = vmatpush.msra.mxu3 %v230_v43 }
  0x20   :  { %296 = vmatpush.msra.mxu1 %v273_v44 }
  0x21   :  { %254 = vmatpush.msra.mxu3 %v229_v46 }
  0x22   :  { %297 = vmatpush.msra.mxu1 %v272_v47 }
  0x23   :  { %255 = vmatpush.msra.mxu3 %v228_v51 }
  0x24   :  { %298 = vmatpush.msra.mxu1 %v271_v52 }
  0x25   :  { %256 = vmatpush.msra.mxu3 %v227_v54 }
  0x26   :  { %299 = vmatpush.msra.mxu1 %v270_v55 }
  0x27   :  { %257 = vmatpush.msra.mxu3 %v226_v58 }
  0x28   :  { %300 = vmatpush.msra.mxu1 %v269_v59 }
  0x86   :  { %v63_v12 = vpop.f32.mrf.mxu0 }
  0x87   :  { %371 = vmatmul.msk.f32.vlgmr.msra.gmra.mxu2 %vm77_vm1, %v63_v12 }
  0x8e   :  { %v66_v13 = vpop.f32.mrf.mxu0 }
  0x8f   :  { %372 = vmatmul.msk.f32.gmra.mxu2 %vm77_vm1, %v66_v13 }
  0x97   :  { %373 = vmatmul.msk.f32.vlgmr.msrb.gmra.mxu2 %vm39_vm0, %v33_v5 }
  0x9f   :  { %374 = vmatmul.msk.f32.gmra.mxu2 %vm39_vm0, %v34_v6 }
 0x10a   :  { %v101_v14 = vpop.f32.mrf.mxu2 }
 0x112   :  { %v104_v25 = vpop.f32.mrf.mxu2 }
 0x11a   :  { %v124_v35 = vpop.f32.mrf.mxu2 }
 0x11b   :  { %v125_v36 = vadd.f32 %v124_v35, %v101_v14 }
 0x11d   :  { %v574_v39 = vadd.f32 %v383_v32, %v125_v36 }
 0x11f   :  { %v583_v42 = vmul.f32 0.70710677, %v574_v39 }
 0x121   :  { %v140_v45 = vmul.f32 %v583_v42, %v583_v42 }
 0x122   :  { %v127_v48 = vpop.f32.mrf.mxu2 }
 0x123   :  { %v141_v49 = vmin.f32 %v140_v45, 16.0  ;;  %v128_v50 = vadd.f32 %v127_v48, %v104_v25 }
 0x125   :  { %v605_v53 = vadd.f32 %v383_v32, %v128_v50  ;;  %v142_v56 = vmul.f32 2.1237322e-06, %v141_v49  ;;  %v153_v57 = vmul.f32 3.8918573e-05, %v141_v49 }
 0x127   :  { %v620_v60 = vmul.f32 0.70710677, %v605_v53  ;;  %v143_v61 = vadd.f32 0.00028619796, %v142_v56  ;;  %v154_v62 = vadd.f32 0.001143296, %v153_v57 }
 0x129   :  { %v180_v63 = vmul.f32 %v620_v60, %v620_v60  ;;  %v144_v0 = vmul.f32 %v143_v61, %v141_v49  ;;  %v155_v1 = vmul.f32 %v154_v62, %v141_v49  ;;  %v136_v62 = vmul.f32 0.5, %v574_v39 }
 0x12a   :  { %v415_v39 = vmov 0.0  }
 0x12b   :  { %v181_v2 = vmin.f32 %v180_v63, 16.0  ;;  %v156_v3 = vadd.f32 0.014752088, %v155_v1  ;;  %v145_v4 = vadd.f32 0.0036580483, %v144_v0  ;;  %69 = vst.msk [vmem:[#allocation2] sm:$0xff] %vm39_vm0, %v415_v39 }
 0x12c   :  { %70 = vst.msk [vmem:[#allocation2 + $0x8] sm:$0xff] %vm39_vm0, %v415_v39 }
 0x12d   :  { %v157_v5 = vmul.f32 %v156_v3, %v141_v49  ;;  %v182_v6 = vmul.f32 2.1237322e-06, %v181_v2  ;;  %v193_v7 = vmul.f32 3.8918573e-05, %v181_v2  ;;  %v146_v10 = vmul.f32 %v145_v4, %v141_v49 }
 0x12f   :  { %v158_v8 = vadd.f32 0.112945676, %v157_v5  ;;  %v183_v9 = vadd.f32 0.00028619796, %v182_v6  ;;  %v194_v11 = vadd.f32 0.001143296, %v193_v7 }
 0x130   :  { %v147_v16 = vadd.f32 0.05243302, %v146_v10  ;;  %v137_v7 = vmul.f32 0.5, %v605_v53 }
 0x131   :  { %v159_v12 = vmul.f32 %v158_v8, %v141_v49  ;;  %v184_v13 = vmul.f32 %v183_v9, %v181_v2  ;;  %v195_v14 = vmul.f32 %v194_v11, %v181_v2 }
 0x132   :  { %v148_v22 = vmul.f32 %v147_v16, %v141_v49  ;;  %v384_v16 = vld [vmem:[%s654_s6] ss:$0 sm:$0xff]  ;;  %s417_s6 = smov 128  }
 0x133   :  { %v160_v15 = vadd.f32 0.4994258, %v159_v12  ;;  %v196_v17 = vadd.f32 0.014752088, %v195_v14  ;;  %v185_v19 = vadd.f32 0.0036580483, %v184_v13 }
 0x134   :  { %v149_v28 = vadd.f32 0.18741608, %v148_v22  ;;  %v225_v53 = vld [vmem:[#allocation2 + $0x8] sm:$0xff] }
 0x135   :  { %v161_v18 = vmul.f32 %v160_v15, %v141_v49  ;;  %v197_v20 = vmul.f32 %v196_v17, %v181_v2  ;;  %v186_v24 = vmul.f32 %v185_v19, %v181_v2 }
 0x136   :  { %v150_v33 = vmul.f32 %v149_v28, %v141_v49 }
 0x137   :  { %v162_v21 = vadd.f32 1.0, %v161_v18  ;;  %v198_v23 = vadd.f32 0.112945676, %v197_v20  ;;  %v187_v30 = vadd.f32 0.05243302, %v186_v24 }
 0x138   :  { %v151_v40 = vadd.f32 1.1283791, %v150_v33 }
 0x139   :  { %385 = vrcp.f32 %v162_v21  ;;  %v199_v25 = vmul.f32 %v198_v23, %v181_v2  ;;  %v188_v36 = vmul.f32 %v187_v30, %v181_v2  ;;  %v174_v38 = vand.u32 2147483648, %v162_v21 }
 0x13a   :  { %v172_v43 = vand.u32 2147483647, %v162_v21  ;;  %vm168_vm3 = vweird.f32 %v162_v21  ;;  %v152_v48 = vmul.f32 %v151_v40, %v583_v42 }
 0x13b   :  { %v200_v29 = vadd.f32 0.4994258, %v199_v25  ;;  %v189_v44 = vadd.f32 0.18741608, %v188_v36  ;;  %v175_v46 = vor.u32 1.1754944e-38, %v174_v38 }
 0x13c   :  { %vm173_vm5 = vcmp.eq.f32.partialorder %v172_v43, 8.507059e+37 }
 0x13d   :  { %v201_v31 = vmul.f32 %v200_v29, %v181_v2  ;;  %v190_v51 = vmul.f32 %v189_v44, %v181_v2 }
 0x13f   :  { %v386_v32 = vpop.eup %385  ;;  %v202_v35 = vadd.f32 1.0, %v201_v31  ;;  %v191_v58 = vadd.f32 1.1283791, %v190_v51 }
 0x140   :  { %v164_v34 = vmul.f32 %v386_v32, %v162_v21  ;;  %vm169_vm2 = vweird.f32 %v386_v32 }
 0x141   :  { %387 = vrcp.f32 %v202_v35  ;;  %vm170_vm4 = vmor %vm168_vm3, %vm169_vm2  ;;  %v214_v57 = vand.u32 2147483648, %v202_v35  ;;  %v212_v61 = vand.u32 2147483647, %v202_v35  ;;  %vm208_vm7 = vweird.f32 %v202_v35 }
 0x142   :  { %v165_v37 = vsub.f32 1.0, %v164_v34  ;;  %v192_v3 = vmul.f32 %v191_v58, %v620_v60  ;;  %v224_v60 = vld [vmem:[#allocation2] sm:$0xff] }
 0x143   :  { %v215_v42 = vor.u32 1.1754944e-38, %v214_v57  ;;  %vm213_vm9 = vcmp.eq.f32.partialorder %v212_v61, 8.507059e+37 }
 0x144   :  { %v166_v41 = vmul.f32 %v386_v32, %v165_v37 }
 0x146   :  { %v167_v45 = vadd.f32 %v386_v32, %v166_v41 }
 0x147   :  { %v388_v47 = vpop.eup %387 }
 0x148   :  { %v171_v50 = vsel %vm170_vm4, %v386_v32, %v167_v45  ;;  %v204_v52 = vmul.f32 %v388_v47, %v202_v35  ;;  %vm209_vm6 = vweird.f32 %v388_v47 }
 0x149   :  { %v176_v49 = vsel %vm173_vm5, %v175_v46, %v171_v50  ;;  %vm210_vm8 = vmor %vm208_vm7, %vm209_vm6 }
 0x14a   :  { %v177_v54 = vmul.f32 %v176_v49, %v152_v48  ;;  %v205_v55 = vsub.f32 1.0, %v204_v52 }
 0x14c   :  { %v375_v56 = vclamps-f32 %v177_v54, 1.0  ;;  %v206_v59 = vmul.f32 %v388_v47, %v205_v55 }
 0x14e   :  { %v220_v63 = vadd.f32 1.0, %v375_v56  ;;  %v207_v0 = vadd.f32 %v388_v47, %v206_v59 }
 0x150   :  { %v222_v1 = vmul.f32 %v220_v63, %v136_v62  ;;  %v211_v2 = vsel %vm210_vm8, %v388_v47, %v207_v0 }
 0x151   :  { %v216_v4 = vsel %vm213_vm9, %v215_v42, %v211_v2 }
 0x152   :  { %258 = vmatmul.f32.vlgmr.msra.gmra.mxu3 %v222_v1  ;;  %301 = vmatmul.f32.vlgmr.msra.gmra.mxu1 %v222_v1  ;;  %v217_v5 = vmul.f32 %v216_v4, %v192_v3 }
 0x154   :  { %v376_v6 = vclamps-f32 %v217_v5, 1.0 }
 0x156   :  { %v221_v8 = vadd.f32 1.0, %v376_v6 }
 0x158   :  { %v223_v9 = vmul.f32 %v221_v8, %v137_v7 }
 0x15a   :  { %261 = vmatmul.f32.gmra.mxu3 %v223_v9  ;;  %304 = vmatmul.f32.gmra.mxu1 %v223_v9 }
 0x1cf   :  { %v302_v10 = vpop.f32.mrf.mxu1 }
 0x1d0   :  { %377 = vmatmul.msk.f32.vlgmr.msrb.gmra.mxu0 %vm77_vm1, %v302_v10 }
 0x1d5   :  { %v259_v11 = vpop.f32.mrf.mxu3 }
 0x1d6   :  { %v265_v12 = vadd.f32 %v259_v11, %v224_v60 }
 0x1d7   :  { %v305_v13 = vpop.f32.mrf.mxu1 }
 0x1d8   :  { %267 = vst.msk [vmem:[#allocation2] sm:$0xff] %vm39_vm0, %v265_v12  ;;  %378 = vmatmul.msk.f32.gmra.mxu0 %vm77_vm1, %v305_v13 }
 0x1dd   :  { %v262_v14 = vpop.f32.mrf.mxu3 }
 0x1de   :  { %v266_v15 = vadd.f32 %v262_v14, %v225_v53 }
 0x1df   :  { %v308_v17 = vld [vmem:[#allocation2] sm:$0xff] }
 0x1e0   :  { %268 = vst.msk [vmem:[#allocation2 + $0x8] sm:$0xff] %vm39_vm0, %v266_v15 }
 0x1e7   :  { %v309_v21 = vld [vmem:[#allocation2 + $0x8] sm:$0xff] }
 0x24d   :  { %v335_v18 = vpop.f32.mrf.mxu0 }
 0x24e   :  { %v341_v19 = vadd.f32 %v335_v18, %v308_v17 }
 0x250   :  { %v347_v20 = vadd.f32 %v384_v16, %v341_v19 }
 0x252   :  { %349 = vst.msk [vmem:[#allocation3] sm:$0xff] %vm39_vm0, %v347_v20 }
 0x255   :  { %v338_v22 = vpop.f32.mrf.mxu0 }
 0x256   :  { %v342_v23 = vadd.f32 %v338_v22, %v309_v21 }
 0x258   :  { %v348_v24 = vadd.f32 %v384_v16, %v342_v23 }
 0x25a   :  { %350 = vst.msk [vmem:[#allocation3 + $0x8] sm:$0xff] %vm39_vm0, %v348_v24 }
 0x25b   :  { %363 = dma.vmem_to_hbm [thread:$0]  %s356_s25, 256, %s358_s28, [#allocation4], %s417_s6, %s417_s6, %s418_s29  }
 0x25c   :  { %413 = dma.done.wait [#allocation4], 256  }
 0x25d   :  { %414 = vsyncadd [#allocation4], 4294967040 }
 0x25e   :  { %368 = vsyncpa [#allocation4], 1 }

</bundles_post_ra>
